<compile_context>
chip_gen: v7x
topology: tpu7x:2x2x1
jax: 0.10.0
libtpu: 0.0.40
codegen_flags: <defaults>
</compile_context>

<pallas_src>
import jax
import jax.numpy as jnp
from jax.experimental import pallas as pl
from jax.experimental.pallas import tpu as pltpu


def _round_up(x, m):
    return ((x + m - 1) // m) * m


def word_encoder_kernel(x_ref, w1_ref, b1_ref, w2_ref, b2_ref, w3_ref, b3_ref, o_ref):
    # Cast the batch tile to bf16 in-kernel (avoids a separate HBM cast pass).
    x = x_ref[...].astype(jnp.bfloat16)
    # Layer 1: Linear(F -> L) + ReLU   (Dropout = identity in eval mode)
    h1 = jnp.maximum(
        jnp.dot(x, w1_ref[...], preferred_element_type=jnp.float32) + b1_ref[...], 0.0
    ).astype(jnp.bfloat16)
    # Layer 2: Linear(L -> mid) + ReLU (Dropout = identity in eval mode)
    h2 = jnp.maximum(
        jnp.dot(h1, w2_ref[...], preferred_element_type=jnp.float32) + b2_ref[...], 0.0
    ).astype(jnp.bfloat16)
    # Layer 3: Linear(mid -> N)
    o_ref[...] = (
        jnp.dot(h2, w3_ref[...], preferred_element_type=jnp.float32) + b3_ref[...]
    ).astype(o_ref.dtype)


def prepare_params(params):
    """One-time param prep (outside the hot path): bf16 weights, (1, dim) f32 biases."""
    w1, b1, w2, b2, w3, b3 = params
    as2d = lambda b: jnp.asarray(b, jnp.float32).reshape(1, -1)
    return (
        jnp.asarray(w1, jnp.bfloat16), as2d(b1),
        jnp.asarray(w2, jnp.bfloat16), as2d(b2),
        jnp.asarray(w3, jnp.bfloat16), as2d(b3),
    )


def word_encoder_forward(
    x,
    prepared_params,
    *,
    batch_tile=2048,
    weight_pipeline_mode=None,   # set to pl.Buffered(1) on v7x with large L/mid
    vmem_limit_bytes=None,       # raise for large hidden dims if needed
):
    """x: (B, num_feats) f32.  prepared_params: output of prepare_params()."""
    w1, b1, w2, b2, w3, b3 = prepared_params
    B, F = x.shape
    L = w1.shape[1]
    M = w2.shape[1]
    N = w3.shape[1]

    # ---- batch tiling: multiples of 16 (bf16 sublane packing), large tiles to
    # amortize per-grid-step overhead, and >= 2 grid steps when possible so the
    # "parallel" axis can shard across v7x's two TensorCores.
    B16 = _round_up(max(B, 1), 16)
    steps = max(2, pl.cdiv(B16, batch_tile))
    TB = min(_round_up(pl.cdiv(B16, steps), 16), _round_up(batch_tile, 16))
    B_p = _round_up(B16, TB)
    grid = (B_p // TB,)

    # Only the batch dim may need zero-padding (padded rows are dropped at the end).
    if B_p != B:
        x = jnp.pad(x, ((0, B_p - B), (0, 0)))

    def resident(shape):
        # Constant index_map -> loaded once, stays resident in VMEM across steps.
        if weight_pipeline_mode is None:
            return pl.BlockSpec(shape, lambda i: (0, 0))
        return pl.BlockSpec(shape, lambda i: (0, 0), pipeline_mode=weight_pipeline_mode)

    out = pl.pallas_call(
        word_encoder_kernel,
        out_shape=jax.ShapeDtypeStruct((B_p, N), jnp.float32),
        grid=grid,
        in_specs=[
            pl.BlockSpec((TB, F), lambda i: (i, 0)),   # batch-tiled input (full F)
            resident((F, L)),
            resident((1, L)),
            resident((L, M)),
            resident((1, M)),
            resident((M, N)),
            resident((1, N)),
        ],
        out_specs=pl.BlockSpec((TB, N), lambda i: (i, 0)),  # real N, no padded writeback
        compiler_params=pltpu.CompilerParams(
            dimension_semantics=("parallel",),
            vmem_limit_bytes=vmem_limit_bytes,
        ),
    )(x, w1, b1, w2, b2, w3, b3)

    return out if B_p == B else out[:B]


def init_params(key, num_feats, L, N):
    """Deterministic init mimicking PyTorch Linear default (uniform +/- 1/sqrt(fan_in))."""
    mid = int((L + N) / 2)
    keys = jax.random.split(key, 6)

    def lin(kw, kb, fan_in, fan_out):
        bound = 1.0 / jnp.sqrt(fan_in)
        w = jax.random.uniform(kw, (fan_in, fan_out), jnp.float32, -bound, bound)
        b = jax.random.uniform(kb, (1, fan_out), jnp.float32, -bound, bound)
        return w, b

    w1, b1 = lin(keys[0], keys[1], num_feats, L)
    w2, b2 = lin(keys[2], keys[3], L, mid)
    w3, b3 = lin(keys[4], keys[5], mid, N)
    return (w1, b1, w2, b2, w3, b3)


def reference_forward(x, params):
    w1, b1, w2, b2, w3, b3 = params
    h1 = jnp.maximum(x @ w1 + b1, 0.0)
    h2 = jnp.maximum(h1 @ w2 + b2, 0.0)
    return h2 @ w3 + b3


if __name__ == "__main__":
    # Small shapes consistent with the module's forward: inp is (batch, num_feats).
    B, num_feats, L, N = 8, 32, 64, 32   # mid = (L + N) // 2 = 48
    key = jax.random.PRNGKey(0)
    k_x, k_p = jax.random.split(key)

    x = jax.random.normal(k_x, (B, num_feats), dtype=jnp.float32)
    params = init_params(k_p, num_feats, L, N)
    prepared = prepare_params(params)   # one-time: bf16 weights, (1, dim) biases

    out = word_encoder_forward(x, prepared)
    out = jax.block_until_ready(out)

    ref = reference_forward(x, params)
    assert out.shape == (B, N)
    # bf16 MXU inputs vs f32 reference -> loosened tolerance.
    assert jnp.allclose(out, ref, atol=5e-2, rtol=5e-2), "Pallas output mismatch vs reference"

    print("KERNEL_OK")
</pallas_src>

<mosaic_0001>
module attributes {stable_mosaic.version = 11 : i64} {
  func.func @word_encoder_kernel(%arg0: i32, %arg1: memref<16x32xf32, #tpu.memory_space<vmem>>, %arg2: memref<32x64xbf16, #tpu.memory_space<vmem>>, %arg3: memref<1x64xf32, #tpu.memory_space<vmem>>, %arg4: memref<64x48xbf16, #tpu.memory_space<vmem>>, %arg5: memref<1x48xf32, #tpu.memory_space<vmem>>, %arg6: memref<48x32xbf16, #tpu.memory_space<vmem>>, %arg7: memref<1x32xf32, #tpu.memory_space<vmem>>, %arg8: memref<16x32xf32, #tpu.memory_space<vmem>>) attributes {dimension_semantics = [#tpu.dimension_semantics<parallel>], iteration_bounds = array<i64: 1>, scalar_prefetch = 0 : i64, scratch_operands = 0 : i64, tpu.core_type = #tpu.core_type<tc>, window_params = [{transform_indices = @transform_0, window_bounds = array<i64: 16, 32>}, {pipeline_mode = #tpu.pipeline_mode<synchronous>, transform_indices = @transform_1, window_bounds = array<i64: 32, 64>}, {pipeline_mode = #tpu.pipeline_mode<synchronous>, transform_indices = @transform_2, window_bounds = array<i64: 1, 64>}, {pipeline_mode = #tpu.pipeline_mode<synchronous>, transform_indices = @transform_3, window_bounds = array<i64: 64, 48>}, {pipeline_mode = #tpu.pipeline_mode<synchronous>, transform_indices = @transform_4, window_bounds = array<i64: 1, 48>}, {pipeline_mode = #tpu.pipeline_mode<synchronous>, transform_indices = @transform_5, window_bounds = array<i64: 48, 32>}, {pipeline_mode = #tpu.pipeline_mode<synchronous>, transform_indices = @transform_6, window_bounds = array<i64: 1, 32>}, {transform_indices = @transform_7, window_bounds = array<i64: 16, 32>}]} {
    %c0 = arith.constant 0 : index
    %c0_0 = arith.constant 0 : index
    %0 = vector.load %arg1[%c0, %c0_0] : memref<16x32xf32, #tpu.memory_space<vmem>>, vector<16x32xf32>
    %1 = arith.truncf %0 : vector<16x32xf32> to vector<16x32xbf16>
    %c0_1 = arith.constant 0 : index
    %c0_2 = arith.constant 0 : index
    %2 = vector.load %arg2[%c0_1, %c0_2] : memref<32x64xbf16, #tpu.memory_space<vmem>>, vector<32x64xbf16>
    %cst = arith.constant dense<0.000000e+00> : vector<16x64xf32>
    %3 = tpu.matmul %1, %2, %cst {dimension_numbers = #tpu.dot_dimension_numbers<[1], [0], [0], [1], [0, 0, 1, 1], [], []>} : vector<16x32xbf16>, vector<32x64xbf16>, vector<16x64xf32> -> vector<16x64xf32>
    %c0_3 = arith.constant 0 : index
    %c0_4 = arith.constant 0 : index
    %4 = vector.load %arg3[%c0_3, %c0_4] : memref<1x64xf32, #tpu.memory_space<vmem>>, vector<1x64xf32>
    %5 = vector.broadcast %4 : vector<1x64xf32> to vector<16x64xf32>
    %6 = arith.addf %3, %5 : vector<16x64xf32>
    %cst_5 = arith.constant 0.000000e+00 : f32
    %7 = vector.broadcast %cst_5 : f32 to vector<16x64xf32>
    %8 = arith.maximumf %6, %7 : vector<16x64xf32>
    %9 = arith.truncf %8 : vector<16x64xf32> to vector<16x64xbf16>
    %c0_6 = arith.constant 0 : index
    %c0_7 = arith.constant 0 : index
    %10 = vector.load %arg4[%c0_6, %c0_7] : memref<64x48xbf16, #tpu.memory_space<vmem>>, vector<64x48xbf16>
    %cst_8 = arith.constant dense<0.000000e+00> : vector<16x48xf32>
    %11 = tpu.matmul %9, %10, %cst_8 {dimension_numbers = #tpu.dot_dimension_numbers<[1], [0], [0], [1], [0, 0, 1, 1], [], []>} : vector<16x64xbf16>, vector<64x48xbf16>, vector<16x48xf32> -> vector<16x48xf32>
    %c0_9 = arith.constant 0 : index
    %c0_10 = arith.constant 0 : index
    %12 = vector.load %arg5[%c0_9, %c0_10] : memref<1x48xf32, #tpu.memory_space<vmem>>, vector<1x48xf32>
    %13 = vector.broadcast %12 : vector<1x48xf32> to vector<16x48xf32>
    %14 = arith.addf %11, %13 : vector<16x48xf32>
    %cst_11 = arith.constant 0.000000e+00 : f32
    %15 = vector.broadcast %cst_11 : f32 to vector<16x48xf32>
    %16 = arith.maximumf %14, %15 : vector<16x48xf32>
    %17 = arith.truncf %16 : vector<16x48xf32> to vector<16x48xbf16>
    %c0_12 = arith.constant 0 : index
    %c0_13 = arith.constant 0 : index
    %18 = vector.load %arg6[%c0_12, %c0_13] : memref<48x32xbf16, #tpu.memory_space<vmem>>, vector<48x32xbf16>
    %cst_14 = arith.constant dense<0.000000e+00> : vector<16x32xf32>
    %19 = tpu.matmul %17, %18, %cst_14 {dimension_numbers = #tpu.dot_dimension_numbers<[1], [0], [0], [1], [0, 0, 1, 1], [], []>} : vector<16x48xbf16>, vector<48x32xbf16>, vector<16x32xf32> -> vector<16x32xf32>
    %c0_15 = arith.constant 0 : index
    %c0_16 = arith.constant 0 : index
    %20 = vector.load %arg7[%c0_15, %c0_16] : memref<1x32xf32, #tpu.memory_space<vmem>>, vector<1x32xf32>
    %21 = vector.broadcast %20 : vector<1x32xf32> to vector<16x32xf32>
    %22 = arith.addf %19, %21 : vector<16x32xf32>
    %c0_17 = arith.constant 0 : index
    %c0_18 = arith.constant 0 : index
    %23 = vector.load %arg8[%c0_17, %c0_18] : memref<16x32xf32, #tpu.memory_space<vmem>>, vector<16x32xf32>
    tpu.vector_store %arg8[%c0_17, %c0_18], %22 {strides = array<i32>} : memref<16x32xf32, #tpu.memory_space<vmem>>, vector<16x32xf32>,
    return
  }
  func.func @transform_0(%arg0: i32) -> (i32, i32) {
    %c0_i32 = arith.constant 0 : i32
    %c0_i32_0 = arith.constant 0 : i32
    return %arg0, %c0_i32 : i32, i32
  }
  func.func @transform_1(%arg0: i32) -> (i32, i32) {
    %c0_i32 = arith.constant 0 : i32
    %c0_i32_0 = arith.constant 0 : i32
    %c0_i32_1 = arith.constant 0 : i32
    return %c0_i32, %c0_i32_0 : i32, i32
  }
  func.func @transform_2(%arg0: i32) -> (i32, i32) {
    %c0_i32 = arith.constant 0 : i32
    %c0_i32_0 = arith.constant 0 : i32
    %c0_i32_1 = arith.constant 0 : i32
    return %c0_i32, %c0_i32_0 : i32, i32
  }
  func.func @transform_3(%arg0: i32) -> (i32, i32) {
    %c0_i32 = arith.constant 0 : i32
    %c0_i32_0 = arith.constant 0 : i32
    %c0_i32_1 = arith.constant 0 : i32
    return %c0_i32, %c0_i32_0 : i32, i32
  }
  func.func @transform_4(%arg0: i32) -> (i32, i32) {
    %c0_i32 = arith.constant 0 : i32
    %c0_i32_0 = arith.constant 0 : i32
    %c0_i32_1 = arith.constant 0 : i32
    return %c0_i32, %c0_i32_0 : i32, i32
  }
  func.func @transform_5(%arg0: i32) -> (i32, i32) {
    %c0_i32 = arith.constant 0 : i32
    %c0_i32_0 = arith.constant 0 : i32
    %c0_i32_1 = arith.constant 0 : i32
    return %c0_i32, %c0_i32_0 : i32, i32
  }
  func.func @transform_6(%arg0: i32) -> (i32, i32) {
    %c0_i32 = arith.constant 0 : i32
    %c0_i32_0 = arith.constant 0 : i32
    %c0_i32_1 = arith.constant 0 : i32
    return %c0_i32, %c0_i32_0 : i32, i32
  }
  func.func @transform_7(%arg0: i32) -> (i32, i32) {
    %c0_i32 = arith.constant 0 : i32
    %c0_i32_0 = arith.constant 0 : i32
    return %arg0, %c0_i32 : i32, i32
  }
}

</mosaic_0001>

<bundles_post_ra>
// kernel: tpu_custom_call.1
= control target key start
LH: loop header
LB: loop body
LE: loop exit
PB: predicated region body
PF: predicated region fallthrough
CT: control target
= control target key end

     0   :  { %v378_v1 = vmov 0.0   ;;  %vm379_vm0 = vmmov 0   ;;  %vm54_vm1 = vcmask 261120   ;;  %s483_s0 = inlined_call_operand.vmem [shape: f32[16,32], index: 0, kind: input, shape index: {}]   ;;  %s484_s1 = inlined_call_operand.vmem [shape: bf16[32,64], index: 1, kind: input, shape index: {}]   ;;  %s485_s2 = inlined_call_operand.vmem [shape: f32[1,64], index: 2, kind: input, shape index: {}]   ;;  %s486_s3 = inlined_call_operand.vmem [shape: bf16[64,48], index: 3, kind: input, shape index: {}]   ;;  %s487_s4 = inlined_call_operand.vmem [shape: f32[1,48], index: 4, kind: input, shape index: {}]   ;;  %s488_s5 = inlined_call_operand.vmem [shape: bf16[48,32], index: 5, kind: input, shape index: {}]   ;;  %s489_s6 = inlined_call_operand.vmem [shape: f32[1,32], index: 6, kind: input, shape index: {}]   ;;  %s490_s7 = inlined_call_operand.hbm [shape: f32[16,32], index: 7, kind: output, shape index: {}]  }
   0x1   :  { %v345_v0 = vld [vmem:[%s484_s1] sm:$0xff]   ;;  %310 = vmatprep.subr.bf16.mxu0 %v378_v1  ;;  %v346_v2 = vld [vmem:[%s484_s1 + $0x8] sm:$0xff]   ;;  %318 = vmatprep.subr.bf16.mxu1 %v378_v1 }
   0x2   :  { %311 = vmatpush3.bf16.msra.mxu0 %v345_v0  ;;  %314 = vmatprep.mubr.msk.bf16.mxu0 %vm379_vm0, %v378_v1  ;;  %v28_v3 = vld [vmem:[%s483_s0] sm:$0xff]  ;;  %v29_v4 = vld [vmem:[%s483_s0 + $0x8] sm:$0xff] }
   0x3   :  { %312 = vmatprep.subr.bf16.mxu0 %v378_v1  ;;  %v347_v5 = vld [vmem:[%s486_s3] sm:$0xff]   ;;  %326 = vmatprep.mubr.msk.bf16.mxu1 %vm379_vm0, %v378_v1  ;;  %v348_v6 = vld [vmem:[%s486_s3 + $0x8] sm:$0xff]   ;;  %v30_v7 = vpack.c.bf16 %v29_v4, %v28_v3 }
   0x4   :  { %319 = vmatpush3.bf16.msra.mxu1 %v347_v5 }
   0x5   :  { %320 = vmatprep.subr.bf16.mxu1 %v378_v1 }
   0x6   :  { %313 = vmatpush3.bf16.msra.mxu0 %v346_v2 }
   0x7   :  { %330 = vmatprep.subr.bf16.mxu0 %v378_v1 }
   0x8   :  { %12 = vsyncpa [#allocation3], 0  ;;  %321 = vmatpush3.bf16.msra.mxu1 %v348_v6  ;;  %v349_v8 = vld [vmem:[%s486_s3 + $0x10] sm:$0xff]   ;;  %v350_v9 = vld [vmem:[%s486_s3 + $0x18] sm:$0xff]   ;;  %vm141_vm2 = vcmask 523264   ;;  %vm220_vm3 = vcmask 392192  }
   0x9   :  { %315 = vmatmul.mubr.msk.bf16.vlgmr.msra.gmra.mrb[0].mxu0 %vm54_vm1, %v30_v7  ;;  %322 = vmatprep.subr.bf16.mxu1 %v378_v1  ;;  %v351_v10 = vld [vmem:[%s488_s5] sm:$0xff]   ;;  %v352_v21 = vld [vmem:[%s488_s5 + $0x8] sm:$0xff]   ;;  %v353_v22 = vld [vmem:[%s488_s5 + $0x10] sm:$0xff]   ;;  %s380_s5 = smov [#allocation2]  }
   0xa   :  { %336 = vmatprep.mubr.msk.bf16.mxu0 %vm379_vm0, %v378_v1  ;;  %331 = vmatpush3.bf16.msra.mxu0 %v351_v10  ;;  %v283_v11 = vld [vmem:[%s485_s2] ss:$0 sm:$0xff]  ;;  %s272_s25 = sshll.u32 %s380_s5, 4  ;;  %s273_s25 = int_to_ptr.vmem [resolvable:$true] %s272_s25 }
   0xb   :  { %332 = vmatprep.subr.bf16.mxu0 %v378_v1  ;;  %v287_v23 = vld [vmem:[%s487_s4] ss:$0 sm:$0xff]  ;;  %s354_s4 = scalar_lea.vmem %s273_s25, 256  ;;  %p359_p1 = scmp.lt.s32.totalorder %s273_s25, %s273_s25 }
   0xc   :  { %323 = vmatpush3.bf16.msra.mxu1 %v349_v8  ;;  %v293_v33 = vld [vmem:[%s489_s6] ss:$0 sm:$0xff]  ;;  %p355_p0 = scmp.ne.s32.totalorder %s273_s25, %s354_s4  ;;  %p360_p2 = scmp.lt.s32.totalorder %s354_s4, %s354_s4 }
   0xd   :  { %324 = vmatprep.subr.bf16.mxu1 %v378_v1 }
   0xe   :  { %333 = vmatpush3.bf16.msra.mxu0 %v352_v21  ;;  %p361_p3 = por %p360_p2, %p359_p1 }
   0xf   :  { %334 = vmatprep.subr.bf16.mxu0 %v378_v1 }
  0x10   :  { %325 = vmatpush3.bf16.msra.mxu1 %v350_v9  ;;  %p362_p4 = pnand %p361_p3, %p355_p0 }
  0x12   :  { %335 = vmatpush3.bf16.msra.mxu0 %v353_v22 }
  0xdc   :  { %v92_v12 = vpop.f32.mrb[0].mxu0 }
  0xdd   :  { %v93_v13 = vadd.f32 %v283_v11, %v92_v12  ;;  %v316_v14 = vpop.f32.mrb[1].mxu0 }
  0xde   :  { %v95_v15 = vpop.f32.mrb[2].mxu0 }
  0xdf   :  { %v96_v16 = vadd.f32 %v283_v11, %v95_v15  ;;  %v317_v17 = vpop.f32.mrb[3].mxu0  ;;  %v99_v18 = vmax.f32 %v93_v13, 0.0 }
  0xe1   :  { %v100_v19 = vmax.f32 %v96_v16, 0.0 }
  0xe3   :  { %v101_v20 = vpack.c.bf16 %v100_v19, %v99_v18 }
  0xe5   :  { %327 = vmatmul.mubr.msk.bf16.vlgmr.msra.gmra.mrb[0].mxu1 %vm141_vm2, %v101_v20 }
 0x1b8   :  { %v179_v24 = vpop.f32.mrb[0].mxu1 }
 0x1b9   :  { %v180_v25 = vadd.f32 %v287_v23, %v179_v24  ;;  %v328_v26 = vpop.f32.mrb[1].mxu1 }
 0x1ba   :  { %v182_v27 = vpop.f32.mrb[2].mxu1 }
 0x1bb   :  { %v183_v28 = vadd.f32 %v287_v23, %v182_v27  ;;  %v329_v29 = vpop.f32.mrb[3].mxu1  ;;  %v186_v30 = vmax.f32 %v180_v25, 0.0 }
 0x1bd   :  { %v187_v31 = vmax.f32 %v183_v28, 0.0 }
 0x1bf   :  { %v188_v32 = vpack.c.bf16 %v187_v31, %v186_v30 }
 0x1c1   :  { %337 = vmatmul.mubr.msk.bf16.vlgmr.msra.gmra.mrb[4].mxu0 %vm220_vm3, %v188_v32 }
 0x294   :  { %v258_v34 = vpop.f32.mrb[4].mxu0 }
 0x295   :  { %v259_v35 = vadd.f32 %v293_v33, %v258_v34  ;;  %v338_v36 = vpop.f32.mrb[5].mxu0 }
 0x296   :  { %v261_v37 = vpop.f32.mrb[6].mxu0 }
 0x297   :  { %265 = vst.msk [vmem:[#allocation2] sm:$0xff] %vm54_vm1, %v259_v35  ;;  %v262_v38 = vadd.f32 %v293_v33, %v261_v37  ;;  %v339_v39 = vpop.f32.mrb[7].mxu0 }
 0x299   :  { %266 = vst.msk [vmem:[#allocation2 + $0x8] sm:$0xff] %vm54_vm1, %v262_v38 }
 0x29a   :  { %365 = shalt.err (!%p362_p4)
}
 0x29b   :  { %s366_s27 = scalar_lea.hbm %s490_s7, 256 }
 0x29c   :  { %p367_p5 = scmp.ne.s32.totalorder %s490_s7, %s366_s27  ;;  %p370_p6 = scmp.lt.u32.totalorder %s366_s27, %s490_s7 }
 0x29e   :  { %p372_p7 = pnand %p370_p6, %p367_p5 }
 0x2a0   :  { %375 = shalt.err (!%p372_p7)
}
 0x2a1   :  { %s381_s9 = smov 128   ;;  %s382_s10 = smov 8  }
 0x2a2   :  { %278 = dma.vmem_to_hbm [thread:$0]  %s273_s25, 256, %s490_s7, [#allocation3], %s381_s9, %s381_s9, %s382_s10  }
 0x2a3   :  { %376 = dma.done.wait [#allocation3], 256  }
 0x2a4   :  { %377 = vsyncadd [#allocation3], 4294967040 }
 0x2a5   :  { %282 = vsyncpa [#allocation3], 1 }

</bundles_post_ra>
